<compile_context>
chip_gen: v6e
topology: v6e:2x2x1
jax: 0.10.0
libtpu: 0.0.40
codegen_flags: <defaults>
</compile_context>

<pallas_src>
import functools

import jax
import jax.numpy as jnp
from jax.experimental import pallas as pl
from jax.experimental.pallas import tpu as pltpu

KERNEL_SIZES = (2, 3, 4, 5)
NEG = -1e30        # mask value for invalid (partial-window) conv positions
PAD_ROWS = 8       # sublane-aligned tail pad for the im2col shifts (>= kmax - 1)


def _round_up(x, m):
    return ((x + m - 1) // m) * m


def _cnn_kernel(ids_ref,                           # SMEM (B_pad*L,) int32  [scalar prefetch]
                table_ref,                         # HBM  (V, E) f32        [pl.ANY]
                wconv_ref, bmask_ref,              # VMEM (kmax*E,N_pad) bf16 / (L,N_pad) f32
                fc1w_ref, fc1b_ref, fc2w_ref, fc2b_ref,
                out_ref,                           # VMEM (TB, O_pad) f32
                emb_ref, sem,                      # scratch: (rows+PAD_ROWS,E) f32, DMA sem
                *, TB, L, E, kmax):
    rows = TB * L
    base = pl.program_id(0) * rows

    # ---- Embedding gather: one small async DMA per token row (exact f32 table rows) ----
    @pl.loop(0, rows)
    def _start(r):
        pltpu.make_async_copy(table_ref.at[pl.ds(ids_ref[base + r], 1)],
                              emb_ref.at[pl.ds(r, 1)], sem.at[0]).start()

    # Zero the sublane-aligned tail pad rows (never written by the DMAs). They are only
    # touched through zero weights / masked positions, but garbage here could inject
    # NaN/Inf (0*Inf) into valid positions of the fused matmul, so they must be finite.
    emb_ref[pl.ds(rows, PAD_ROWS), :] = jnp.zeros((PAD_ROWS, E), jnp.float32)

    @pl.loop(0, rows)
    def _wait(r):
        # Source index is irrelevant for wait (only transfer shape + semaphore matter).
        pltpu.make_async_copy(table_ref.at[pl.ds(0, 1)],
                              emb_ref.at[pl.ds(r, 1)], sem.at[0]).wait()

    # ---- bf16 cast BEFORE im2col, so the cast runs on (rows, E) not (rows, kmax*E) ----
    emb_bf = emb_ref[...].astype(jnp.bfloat16)                      # (rows+PAD_ROWS, E)
    windows = jnp.concatenate(
        [emb_bf[j:j + rows, :] for j in range(kmax)], axis=-1)      # (rows, kmax*E)

    # ---- ONE fused conv matmul for all kernel sizes (K = kmax*E, N = N_pad) ----
    conv = jnp.dot(windows, wconv_ref[...],
                   preferred_element_type=jnp.float32)              # (rows, N_pad) f32

    # bias + (-1e30 where a branch's window runs past the valid sequence, t > L-k),
    # broadcast over the batch tile. The mask must stay BEFORE the ReLU: masked slots
    # clamp to 0 and never win the time-max since valid ReLU outputs are >= 0.
    act = jnp.maximum(conv.reshape(TB, L, -1) + bmask_ref[...][None, :, :], 0.0)
    feat = jnp.max(act, axis=1)                                     # (TB, N_pad)

    # ---- MLP head (Dropout(p=0.5) is identity in eval mode) ----
    h = jnp.dot(feat.astype(jnp.bfloat16), fc1w_ref[...],
                preferred_element_type=jnp.float32) + fc1b_ref[...]
    h = jnp.maximum(h, 0.0)                                         # ReLU
    out_ref[...] = jnp.dot(h.astype(jnp.bfloat16), fc2w_ref[...],
                           preferred_element_type=jnp.float32) + fc2b_ref[...]


def cnn_message_classifier(token_ids, embeddings, params, *,
                           kernel_sizes=KERNEL_SIZES, tb=None):
    B, L = token_ids.shape
    V, E = embeddings.shape
    nk = len(kernel_sizes)
    kmax = max(kernel_sizes)
    assert L >= kmax, "sequence must be at least as long as the largest conv kernel"
    assert PAD_ROWS >= kmax - 1

    C = params[f"conv{kernel_sizes[0]}_w"].shape[-1]        # kernel_num
    H = params["fc1_w"].shape[-1]                           # 200
    NCLS = params["fc2_w"].shape[-1]

    # Lane-dense padded sizes.
    C_pad = _round_up(C, 32)            # per-branch channel pad (8 -> 32)
    N_pad = nk * C_pad                  # fused conv output lanes (128 here)
    H_pad = _round_up(H, 128)           # fc hidden 200 -> 256
    O_pad = _round_up(NCLS, 128)        # classes 6 -> 128
    assert N_pad % 128 == 0

    # Batch tile: multiple of 8 sublanes (full unmasked output stores) and enough rows
    # per grid step (TB*L) to fill the MXU M dimension, but no larger than the batch.
    if tb is None:
        tb = max(8, min(_round_up(B, 8), _round_up(pl.cdiv(256, L), 8)))
    TB = tb
    assert TB % 8 == 0
    B_pad = _round_up(B, TB)
    grid = (B_pad // TB,)
    rows = TB * L

    # Token ids, flattened; padded batch rows use id 0 (their outputs are sliced away;
    # they can only be read by *masked* tail windows of the last real sequence).
    ids = jnp.zeros((B_pad, L), jnp.int32).at[:B].set(token_ids.astype(jnp.int32))
    ids_flat = ids.reshape(B_pad * L)

    # ---- Pack the four conv weights into one (kmax*E, N_pad) matrix; fold bias+mask ----
    w_fused = jnp.zeros((kmax * E, N_pad), jnp.float32)
    bias_mask = jnp.full((L, N_pad), NEG, jnp.float32)      # per-position, NOT tiled by B
    t = jnp.arange(L)[:, None]
    for i, k in enumerate(kernel_sizes):
        w = params[f"conv{k}_w"]                            # (k, E, C)
        b = params[f"conv{k}_b"]                            # (1, C)
        w_fused = w_fused.at[:k * E, i * C_pad:i * C_pad + C].set(w.reshape(k * E, C))
        col = jnp.zeros((L, C_pad), jnp.float32).at[:, :C].set(jnp.broadcast_to(b, (L, C)))
        bias_mask = bias_mask.at[:, i * C_pad:(i + 1) * C_pad].set(
            jnp.where(t <= L - k, col, NEG))                # valid conv positions: t <= L-k

    # ---- Zero-pad the MLP weights to lane-dense shapes (padded lanes contribute 0) ----
    fc1w = jnp.zeros((N_pad, H_pad), jnp.float32)
    for i in range(nk):
        fc1w = fc1w.at[i * C_pad:i * C_pad + C, :H].set(params["fc1_w"][i * C:(i + 1) * C, :])
    fc1b = jnp.zeros((1, H_pad), jnp.float32).at[:, :H].set(params["fc1_b"])
    fc2w = jnp.zeros((H_pad, O_pad), jnp.float32).at[:H, :NCLS].set(params["fc2_w"])
    fc2b = jnp.zeros((1, O_pad), jnp.float32).at[:, :NCLS].set(params["fc2_b"])

    const = lambda i, ids: (0, 0)   # weight operands stay VMEM-resident across the grid
    grid_spec = pltpu.PrefetchScalarGridSpec(
        num_scalar_prefetch=1,
        grid=grid,
        in_specs=[
            pl.BlockSpec(memory_space=pl.ANY),              # f32 embedding table (HBM)
            pl.BlockSpec((kmax * E, N_pad), const),         # fused conv weights (bf16)
            pl.BlockSpec((L, N_pad), const),                # bias + position mask (f32)
            pl.BlockSpec((N_pad, H_pad), const),            # fc1 weight (bf16)
            pl.BlockSpec((1, H_pad), const),                # fc1 bias (f32)
            pl.BlockSpec((H_pad, O_pad), const),            # fc2 weight (bf16)
            pl.BlockSpec((1, O_pad), const),                # fc2 bias (f32)
        ],
        out_specs=pl.BlockSpec((TB, O_pad), lambda i, ids: (i, 0)),
        scratch_shapes=[
            pltpu.VMEM((rows + PAD_ROWS, E), jnp.float32),  # gathered embedding rows
            pltpu.SemaphoreType.DMA((1,)),
        ],
    )
    kernel = functools.partial(_cnn_kernel, TB=TB, L=L, E=E, kmax=kmax)
    out = pl.pallas_call(
        kernel,
        out_shape=jax.ShapeDtypeStruct((B_pad, O_pad), jnp.float32),
        grid_spec=grid_spec,
        compiler_params=pltpu.CompilerParams(
            dimension_semantics=("parallel",),              # shards batch tiles on v7x
            vmem_limit_bytes=32 * 1024 * 1024),             # explicit scoped-VMEM budget
    )(ids_flat,
      embeddings.astype(jnp.float32),
      w_fused.astype(jnp.bfloat16),
      bias_mask,
      fc1w.astype(jnp.bfloat16), fc1b,
      fc2w.astype(jnp.bfloat16), fc2b)
    return out[:B, :NCLS]


def _reference(token_ids, embeddings, params, *, kernel_sizes=KERNEL_SIZES,
               bf16_operands=False):
    """Pure-JAX reference mirroring the PyTorch forward (eval mode).

    With bf16_operands=True the matmul operands are rounded to bf16 (f32 accumulation),
    matching the kernel's MXU precision choice, so the comparison can be tight.
    """
    cast = ((lambda x: x.astype(jnp.bfloat16).astype(jnp.float32))
            if bf16_operands else (lambda x: x))
    emb = jnp.take(embeddings, token_ids, axis=0).astype(jnp.float32)
    B, L, _ = emb.shape
    feats = []
    for k in kernel_sizes:
        w = params[f"conv{k}_w"]
        b = params[f"conv{k}_b"]
        Lk = L - k + 1
        acc = jnp.zeros((B, Lk, w.shape[-1]), jnp.float32)
        for j in range(k):
            acc = acc + jnp.einsum("ble,ec->blc", cast(emb[:, j:j + Lk, :]), cast(w[j]),
                                   preferred_element_type=jnp.float32)
        acc = jax.nn.relu(acc + b[None, :, :])
        feats.append(jnp.max(acc, axis=1))
    feat = jnp.concatenate(feats, axis=1)
    h = jax.nn.relu(jnp.dot(cast(feat), cast(params["fc1_w"]),
                            preferred_element_type=jnp.float32) + params["fc1_b"])
    return jnp.dot(cast(h), cast(params["fc2_w"]),
                   preferred_element_type=jnp.float32) + params["fc2_b"]


def _make_params(key, *, vocab, embed_dim, kernel_num, n_classes, hidden=200,
                 kernel_sizes=KERNEL_SIZES):
    keys = jax.random.split(key, 3 + 2 * len(kernel_sizes))
    params = {}
    params["embeddings"] = jax.random.normal(keys[0], (vocab, embed_dim), jnp.float32)
    for i, k in enumerate(kernel_sizes):
        params[f"conv{k}_w"] = 0.1 * jax.random.normal(
            keys[1 + i], (k, embed_dim, kernel_num), jnp.float32)
        params[f"conv{k}_b"] = 0.1 * jax.random.normal(
            keys[1 + len(kernel_sizes) + i], (1, kernel_num), jnp.float32)
    in_feat = kernel_num * len(kernel_sizes)
    params["fc1_w"] = 0.1 * jax.random.normal(keys[-2], (in_feat, hidden), jnp.float32)
    params["fc1_b"] = jnp.zeros((1, hidden), jnp.float32)
    params["fc2_w"] = 0.1 * jax.random.normal(keys[-1], (hidden, n_classes), jnp.float32)
    params["fc2_b"] = jnp.zeros((1, n_classes), jnp.float32)
    return params


if __name__ == "__main__":
    # Small, deterministic shapes consistent with the module:
    # batch=2, seq_len=16, vocab=50, embed_dim=32, kernel_num=8, n_classes=6.
    B, L, V, E, C, NCLS = 2, 16, 50, 32, 8, 6

    key = jax.random.PRNGKey(0)
    pkey, xkey = jax.random.split(key)
    params = _make_params(pkey, vocab=V, embed_dim=E, kernel_num=C, n_classes=NCLS)
    embeddings = params["embeddings"]
    token_ids = jax.random.randint(xkey, (B, L), 0, V, dtype=jnp.int32)

    out = cnn_message_classifier(token_ids, embeddings, params)
    out = jax.block_until_ready(out)
    assert out.shape == (B, NCLS)

    # Tight check vs a reference with matched (bf16-operand, f32-accumulate) precision.
    ref_bf16 = _reference(token_ids, embeddings, params, bf16_operands=True)
    assert jnp.allclose(out, ref_bf16, atol=1e-2, rtol=1e-2), \
        "Pallas output mismatch vs matched-precision reference"
    # Loose sanity check vs the pure-f32 PyTorch-faithful reference (bf16 MXU operands).
    ref_f32 = _reference(token_ids, embeddings, params, bf16_operands=False)
    assert jnp.allclose(out, ref_f32, atol=2.5e-1, rtol=2.5e-1), \
        "Pallas output mismatch vs f32 reference"

    print("KERNEL_OK")
</pallas_src>

<mosaic_0001>
module attributes {stable_mosaic.version = 11 : i64} {
  func.func @_cnn_kernel(%arg0: i32, %arg1: memref<128xi32, #tpu.memory_space<smem>>, %arg2: memref<50x32xf32, #tpu.memory_space<any>>, %arg3: memref<160x128xbf16, #tpu.memory_space<vmem>>, %arg4: memref<16x128xf32, #tpu.memory_space<vmem>>, %arg5: memref<128x256xbf16, #tpu.memory_space<vmem>>, %arg6: memref<1x256xf32, #tpu.memory_space<vmem>>, %arg7: memref<256x128xbf16, #tpu.memory_space<vmem>>, %arg8: memref<1x128xf32, #tpu.memory_space<vmem>>, %arg9: memref<8x128xf32, #tpu.memory_space<vmem>>, %arg10: memref<136x32xf32, #tpu.memory_space<vmem>>, %arg11: memref<1x!tpu.dma_semaphore, #tpu.memory_space<semaphore_mem>>) attributes {dimension_semantics = [#tpu.dimension_semantics<parallel>], iteration_bounds = array<i64: 1>, scalar_prefetch = 1 : i64, scratch_operands = 2 : i64, tpu.core_type = #tpu.core_type<tc>, window_params = [{}, {pipeline_mode = #tpu.pipeline_mode<synchronous>, transform_indices = @transform_1, window_bounds = array<i64: 160, 128>}, {pipeline_mode = #tpu.pipeline_mode<synchronous>, transform_indices = @transform_2, window_bounds = array<i64: 16, 128>}, {pipeline_mode = #tpu.pipeline_mode<synchronous>, transform_indices = @transform_3, window_bounds = array<i64: 128, 256>}, {pipeline_mode = #tpu.pipeline_mode<synchronous>, transform_indices = @transform_4, window_bounds = array<i64: 1, 256>}, {pipeline_mode = #tpu.pipeline_mode<synchronous>, transform_indices = @transform_5, window_bounds = array<i64: 256, 128>}, {pipeline_mode = #tpu.pipeline_mode<synchronous>, transform_indices = @transform_6, window_bounds = array<i64: 1, 128>}, {transform_indices = @transform_7, window_bounds = array<i64: 8, 128>}]} {
    %c128_i32 = arith.constant 128 : i32
    %0 = arith.muli %arg0, %c128_i32 : i32
    %c0_i32 = arith.constant 0 : i32
    %c128_i32_0 = arith.constant 128 : i32
    %1 = arith.addi %c0_i32, %c128_i32_0 : i32
    %c1_i32 = arith.constant 1 : i32
    scf.for %arg12 = %c0_i32 to %1 step %c1_i32  : i32 {
      %c1_i32_28 = arith.constant 1 : i32
      %38 = arith.muli %arg12, %c1_i32_28 : i32
      %c0_i32_29 = arith.constant 0 : i32
      %39 = arith.addi %c0_i32_29, %38 : i32
      %40 = arith.addi %0, %39 : i32
      %41 = arith.index_cast %40 : i32 to index
      %42 = memref.load %arg1[%41] : memref<128xi32, #tpu.memory_space<smem>>
      %c0_i32_30 = arith.constant 0 : i32
      %c0_i32_31 = arith.constant 0 : i32
      %43 = tpu.memref_slice %arg2[%42, %c0_i32_31] : memref<50x32xf32, #tpu.memory_space<any>> -> memref<1x32xf32, #tpu.memory_space<any>>
      %c0_i32_32 = arith.constant 0 : i32
      %44 = tpu.memref_slice %arg10[%39, %c0_i32_32] : memref<136x32xf32, #tpu.memory_space<vmem>> -> memref<1x32xf32, #tpu.memory_space<vmem>>
      %45 = tpu.memref_slice %arg11[%c0_i32_30] : memref<1x!tpu.dma_semaphore, #tpu.memory_space<semaphore_mem>> -> memref<1x!tpu.dma_semaphore, #tpu.memory_space<semaphore_mem>>
      %46 = tpu.memref_squeeze %45 : memref<1x!tpu.dma_semaphore, #tpu.memory_space<semaphore_mem>> -> memref<!tpu.dma_semaphore, #tpu.memory_space<semaphore_mem>>
      tpu.enqueue_dma source(%43 : memref<1x32xf32, #tpu.memory_space<any>>) target(%44 : memref<1x32xf32, #tpu.memory_space<vmem>>) target_semaphore(%46 : memref<!tpu.dma_semaphore, #tpu.memory_space<semaphore_mem>>)
    }
    %c128_i32_1 = arith.constant 128 : i32
    %cst = arith.constant 0.000000e+00 : f32
    %2 = vector.broadcast %cst : f32 to vector<8x32xf32>
    %c128 = arith.constant 128 : index
    %c0 = arith.constant 0 : index
    %3 = vector.load %arg10[%c128, %c0] : memref<136x32xf32, #tpu.memory_space<vmem>>, vector<8x32xf32>
    tpu.vector_store %arg10[%c128, %c0], %2 {strides = array<i32>} : memref<136x32xf32, #tpu.memory_space<vmem>>, vector<8x32xf32>,
    %c0_i32_2 = arith.constant 0 : i32
    %c128_i32_3 = arith.constant 128 : i32
    %4 = arith.addi %c0_i32_2, %c128_i32_3 : i32
    %c1_i32_4 = arith.constant 1 : i32
    scf.for %arg12 = %c0_i32_2 to %4 step %c1_i32_4  : i32 {
      %c1_i32_28 = arith.constant 1 : i32
      %38 = arith.muli %arg12, %c1_i32_28 : i32
      %c0_i32_29 = arith.constant 0 : i32
      %39 = arith.addi %c0_i32_29, %38 : i32
      %c0_i32_30 = arith.constant 0 : i32
      %c0_i32_31 = arith.constant 0 : i32
      %c0_i32_32 = arith.constant 0 : i32
      %40 = tpu.memref_slice %arg2[%c0_i32_31, %c0_i32_32] : memref<50x32xf32, #tpu.memory_space<any>> -> memref<1x32xf32, #tpu.memory_space<any>>
      %c0_i32_33 = arith.constant 0 : i32
      %41 = tpu.memref_slice %arg10[%39, %c0_i32_33] : memref<136x32xf32, #tpu.memory_space<vmem>> -> memref<1x32xf32, #tpu.memory_space<vmem>>
      %42 = tpu.memref_slice %arg11[%c0_i32_30] : memref<1x!tpu.dma_semaphore, #tpu.memory_space<semaphore_mem>> -> memref<1x!tpu.dma_semaphore, #tpu.memory_space<semaphore_mem>>
      %43 = tpu.memref_squeeze %42 : memref<1x!tpu.dma_semaphore, #tpu.memory_space<semaphore_mem>> -> memref<!tpu.dma_semaphore, #tpu.memory_space<semaphore_mem>>
      tpu.wait_dma2 semaphore(%43 : memref<!tpu.dma_semaphore, #tpu.memory_space<semaphore_mem>>) src(%40 : memref<1x32xf32, #tpu.memory_space<any>>) dst(%41 : memref<1x32xf32, #tpu.memory_space<vmem>>)
    }
    %c128_i32_5 = arith.constant 128 : i32
    %c0_6 = arith.constant 0 : index
    %c0_7 = arith.constant 0 : index
    %5 = vector.load %arg10[%c0_6, %c0_7] : memref<136x32xf32, #tpu.memory_space<vmem>>, vector<136x32xf32>
    %6 = arith.truncf %5 : vector<136x32xf32> to vector<136x32xbf16>
    %7 = vector.extract_strided_slice %6 {offsets = [0, 0], sizes = [128, 32], strides = [1, 1]} : vector<136x32xbf16> to vector<128x32xbf16>
    %8 = vector.extract_strided_slice %6 {offsets = [1, 0], sizes = [128, 32], strides = [1, 1]} : vector<136x32xbf16> to vector<128x32xbf16>
    %9 = vector.extract_strided_slice %6 {offsets = [2, 0], sizes = [128, 32], strides = [1, 1]} : vector<136x32xbf16> to vector<128x32xbf16>
    %10 = vector.extract_strided_slice %6 {offsets = [3, 0], sizes = [128, 32], strides = [1, 1]} : vector<136x32xbf16> to vector<128x32xbf16>
    %11 = vector.extract_strided_slice %6 {offsets = [4, 0], sizes = [128, 32], strides = [1, 1]} : vector<136x32xbf16> to vector<128x32xbf16>
    %12 = tpu.concatenate %7, %8, %9, %10, %11 in 1 : vector<128x32xbf16>, vector<128x32xbf16>, vector<128x32xbf16>, vector<128x32xbf16>, vector<128x32xbf16> -> vector<128x160xbf16>
    %c0_8 = arith.constant 0 : index
    %c0_9 = arith.constant 0 : index
    %13 = vector.load %arg3[%c0_8, %c0_9] : memref<160x128xbf16, #tpu.memory_space<vmem>>, vector<160x128xbf16>
    %cst_10 = arith.constant dense<0.000000e+00> : vector<128x128xf32>
    %14 = tpu.matmul %12, %13, %cst_10 {dimension_numbers = #tpu.dot_dimension_numbers<[1], [0], [0], [1], [0, 0, 1, 1], [], []>} : vector<128x160xbf16>, vector<160x128xbf16>, vector<128x128xf32> -> vector<128x128xf32>
    %15 = vector.shape_cast %14 : vector<128x128xf32> to vector<8x16x128xf32>
    %c0_11 = arith.constant 0 : index
    %c0_12 = arith.constant 0 : index
    %16 = vector.load %arg4[%c0_11, %c0_12] : memref<16x128xf32, #tpu.memory_space<vmem>>, vector<16x128xf32>
    %17 = vector.shape_cast %16 : vector<16x128xf32> to vector<1x16x128xf32>
    %18 = vector.broadcast %17 : vector<1x16x128xf32> to vector<8x16x128xf32>
    %19 = arith.addf %15, %18 : vector<8x16x128xf32>
    %cst_13 = arith.constant 0.000000e+00 : f32
    %20 = vector.broadcast %cst_13 : f32 to vector<8x16x128xf32>
    %21 = arith.maximumf %19, %20 : vector<8x16x128xf32>
    %cst_14 = arith.constant dense<0xFF800000> : vector<8x128xf32>
    %22 = vector.multi_reduction <maximumf>, %21, %cst_14 [1] : vector<8x16x128xf32> to vector<8x128xf32>
    %23 = arith.truncf %22 : vector<8x128xf32> to vector<8x128xbf16>
    %c0_15 = arith.constant 0 : index
    %c0_16 = arith.constant 0 : index
    %24 = vector.load %arg5[%c0_15, %c0_16] : memref<128x256xbf16, #tpu.memory_space<vmem>>, vector<128x256xbf16>
    %cst_17 = arith.constant dense<0.000000e+00> : vector<8x256xf32>
    %25 = tpu.matmul %23, %24, %cst_17 {dimension_numbers = #tpu.dot_dimension_numbers<[1], [0], [0], [1], [0, 0, 1, 1], [], []>} : vector<8x128xbf16>, vector<128x256xbf16>, vector<8x256xf32> -> vector<8x256xf32>
    %c0_18 = arith.constant 0 : index
    %c0_19 = arith.constant 0 : index
    %26 = vector.load %arg6[%c0_18, %c0_19] : memref<1x256xf32, #tpu.memory_space<vmem>>, vector<1x256xf32>
    %27 = vector.broadcast %26 : vector<1x256xf32> to vector<8x256xf32>
    %28 = arith.addf %25, %27 : vector<8x256xf32>
    %cst_20 = arith.constant 0.000000e+00 : f32
    %29 = vector.broadcast %cst_20 : f32 to vector<8x256xf32>
    %30 = arith.maximumf %28, %29 : vector<8x256xf32>
    %31 = arith.truncf %30 : vector<8x256xf32> to vector<8x256xbf16>
    %c0_21 = arith.constant 0 : index
    %c0_22 = arith.constant 0 : index
    %32 = vector.load %arg7[%c0_21, %c0_22] : memref<256x128xbf16, #tpu.memory_space<vmem>>, vector<256x128xbf16>
    %cst_23 = arith.constant dense<0.000000e+00> : vector<8x128xf32>
    %33 = tpu.matmul %31, %32, %cst_23 {dimension_numbers = #tpu.dot_dimension_numbers<[1], [0], [0], [1], [0, 0, 1, 1], [], []>} : vector<8x256xbf16>, vector<256x128xbf16>, vector<8x128xf32> -> vector<8x128xf32>
    %c0_24 = arith.constant 0 : index
    %c0_25 = arith.constant 0 : index
    %34 = vector.load %arg8[%c0_24, %c0_25] : memref<1x128xf32, #tpu.memory_space<vmem>>, vector<1x128xf32>
    %35 = vector.broadcast %34 : vector<1x128xf32> to vector<8x128xf32>
    %36 = arith.addf %33, %35 : vector<8x128xf32>
    %c0_26 = arith.constant 0 : index
    %c0_27 = arith.constant 0 : index
    %37 = vector.load %arg9[%c0_26, %c0_27] : memref<8x128xf32, #tpu.memory_space<vmem>>, vector<8x128xf32>
    tpu.vector_store %arg9[%c0_26, %c0_27], %36 {strides = array<i32>} : memref<8x128xf32, #tpu.memory_space<vmem>>, vector<8x128xf32>,
    return
  }
  func.func @transform_1(%arg0: i32, %arg1: memref<128xi32, #tpu.memory_space<smem>>) -> (i32, i32) {
    %c0_i32 = arith.constant 0 : i32
    %c0_i32_0 = arith.constant 0 : i32
    %c0_i32_1 = arith.constant 0 : i32
    return %c0_i32, %c0_i32_0 : i32, i32
  }
  func.func @transform_2(%arg0: i32, %arg1: memref<128xi32, #tpu.memory_space<smem>>) -> (i32, i32) {
    %c0_i32 = arith.constant 0 : i32
    %c0_i32_0 = arith.constant 0 : i32
    %c0_i32_1 = arith.constant 0 : i32
    return %c0_i32, %c0_i32_0 : i32, i32
  }
  func.func @transform_3(%arg0: i32, %arg1: memref<128xi32, #tpu.memory_space<smem>>) -> (i32, i32) {
    %c0_i32 = arith.constant 0 : i32
    %c0_i32_0 = arith.constant 0 : i32
    %c0_i32_1 = arith.constant 0 : i32
    return %c0_i32, %c0_i32_0 : i32, i32
  }
  func.func @transform_4(%arg0: i32, %arg1: memref<128xi32, #tpu.memory_space<smem>>) -> (i32, i32) {
    %c0_i32 = arith.constant 0 : i32
    %c0_i32_0 = arith.constant 0 : i32
    %c0_i32_1 = arith.constant 0 : i32
    return %c0_i32, %c0_i32_0 : i32, i32
  }
  func.func @transform_5(%arg0: i32, %arg1: memref<128xi32, #tpu.memory_space<smem>>) -> (i32, i32) {
    %c0_i32 = arith.constant 0 : i32
    %c0_i32_0 = arith.constant 0 : i32
    %c0_i32_1 = arith.constant 0 : i32
    return %c0_i32, %c0_i32_0 : i32, i32
  }
  func.func @transform_6(%arg0: i32, %arg1: memref<128xi32, #tpu.memory_space<smem>>) -> (i32, i32) {
    %c0_i32 = arith.constant 0 : i32
    %c0_i32_0 = arith.constant 0 : i32
    %c0_i32_1 = arith.constant 0 : i32
    return %c0_i32, %c0_i32_0 : i32, i32
  }
  func.func @transform_7(%arg0: i32, %arg1: memref<128xi32, #tpu.memory_space<smem>>) -> (i32, i32) {
    %c0_i32 = arith.constant 0 : i32
    %c0_i32_0 = arith.constant 0 : i32
    return %arg0, %c0_i32 : i32, i32
  }
}

</mosaic_0001>

<bundles_post_ra>
// kernel: tpu_custom_call.1
= control target key start
LH: loop header
LB: loop body
LE: loop exit
PB: predicated region body
PF: predicated region fallthrough
CT: control target
= control target key end

     0   :  { %s1705_s0 = inlined_call_operand.vmem [shape: s32[128], index: 0, kind: input, shape index: {}]   ;;  %s1706_s1 = inlined_call_operand.vmem [shape: f32[50,32], index: 1, kind: input, shape index: {}]   ;;  %s1707_s2 = inlined_call_operand.vmem [shape: bf16[160,128], index: 2, kind: input, shape index: {}]   ;;  %s1708_s3 = inlined_call_operand.hbm [shape: f32[16,128], index: 3, kind: input, shape index: {}]   ;;  %s1709_s4 = inlined_call_operand.hbm [shape: bf16[128,256], index: 4, kind: input, shape index: {}]   ;;  %s1710_s5 = inlined_call_operand.vmem [shape: f32[1,256], index: 5, kind: input, shape index: {}]   ;;  %s1711_s6 = inlined_call_operand.hbm [shape: bf16[256,128], index: 6, kind: input, shape index: {}]   ;;  %s1712_s7 = inlined_call_operand.vmem [shape: f32[1,128], index: 7, kind: input, shape index: {}]   ;;  %s1713_s8 = inlined_call_operand.hbm [shape: f32[8,128], index: 8, kind: output, shape index: {}]  }
   0x1   :  { %s13_s29 = sshll.u32 %s1705_s0, 4  ;;  %s14_s29 = int_to_ptr.vmem [resolvable:$true] %s13_s29 }
   0x2   :  { %s1283_s30 = scalar_lea.vmem %s14_s29, 16  ;;  %p1288_p1 = scmp.lt.s32.totalorder %s14_s29, %s14_s29 }
   0x3   :  { %p1284_p0 = scmp.ne.s32.totalorder %s14_s29, %s1283_s30  ;;  %p1289_p2 = scmp.lt.s32.totalorder %s1283_s30, %s1283_s30 }
   0x5   :  { %p1290_p3 = por %p1289_p2, %p1288_p1 }
   0x7   :  { %p1291_p4 = pnand %p1290_p3, %p1284_p0 }
   0x9   :  { %1294 = shalt.err (!%p1291_p4)  }
   0xa   :  { %s1401_s9 = smov [#allocation5]  }
   0xb   :  { %16 = dma.vmem_to_smem %s14_s29, 16, %s1401_s9, [#allocation4] }
   0xc   :  { %1383 = dma.done.wait [#allocation4], 16 }
   0xd   :  { %1384 = vsyncadd [#allocation4], 4294967280 }
   0xe   :  { %18 = sfence }
   0xf   :  { %19 = vsyncpa [#allocation7], 0 }
  0x10   :  { %20 = vsyncpa [#allocation10], 0 }
  0x11   :  { %21 = vsyncpa [#allocation8], 0  ;;  %s1402_s10 = smov [#allocation9]   ;;  %s1403_s12 = smov [#allocation6]  }
  0x12   :  { %s41_s11 = sshll.u32 %s1402_s10, 4  ;;  %s29_s0 = sshll.u32 %s1403_s12, 4  ;;  %s42_s11 = int_to_ptr.vmem [resolvable:$true] %s41_s11  ;;  %s30_s0 = int_to_ptr.vmem [resolvable:$true] %s29_s0 }
  0x13   :  { %s1303_s13 = scalar_lea.vmem %s42_s11, 2048  ;;  %p1308_p6 = scmp.lt.s32.totalorder %s42_s11, %s42_s11 }
  0x14   :  { %p1304_p5 = scmp.ne.s32.totalorder %s42_s11, %s1303_s13  ;;  %p1309_p7 = scmp.lt.s32.totalorder %s1303_s13, %s1303_s13 }
  0x16   :  { %p1310_p8 = por %p1309_p7, %p1308_p6 }
  0x18   :  { %p1311_p9 = pnand %p1310_p8, %p1304_p5 }
  0x1a   :  { %1314 = shalt.err (!%p1311_p9)
}
  0x1b   :  { %s1404_s14 = smov 128   ;;  %s1405_s15 = smov 8  }
  0x1c   :  { %47 = dma.hbm_to_vmem [thread:$0]  %s1709_s4, 2048, %s42_s11, [#allocation10], %s1404_s14, %s1404_s14, %s1405_s15  }
  0x1d   :  { %s1323_s18 = scalar_lea.vmem %s30_s0, 256  ;;  %p1328_p11 = scmp.lt.s32.totalorder %s30_s0, %s30_s0 }
  0x1e   :  { %p1324_p10 = scmp.ne.s32.totalorder %s30_s0, %s1323_s18  ;;  %p1329_p12 = scmp.lt.s32.totalorder %s1323_s18, %s1323_s18 }
  0x20   :  { %p1330_p13 = por %p1329_p12, %p1328_p11 }
  0x22   :  { %p1331_p0 = pnand %p1330_p13, %p1324_p10 }
  0x24   :  { %1334 = shalt.err (!%p1331_p0)
}
  0x25   :  { %35 = dma.hbm_to_vmem [thread:$0]  %s1708_s3, 256, %s30_s0, [#allocation7], %s1404_s14, %s1404_s14, %s1405_s15  }
  0x26   :  { %s1406_s21 = smov [#allocation11]  }
  0x27   :  { %s55_s22 = sshll.u32 %s1406_s21, 4  ;;  %s56_s22 = int_to_ptr.vmem [resolvable:$true] %s55_s22 }
  0x28   :  { %s1343_s23 = scalar_lea.vmem %s56_s22, 2048  ;;  %p1348_p2 = scmp.lt.s32.totalorder %s56_s22, %s56_s22 }
  0x29   :  { %p1344_p1 = scmp.ne.s32.totalorder %s56_s22, %s1343_s23  ;;  %p1349_p3 = scmp.lt.s32.totalorder %s1343_s23, %s1343_s23 }
  0x2b   :  { %p1350_p4 = por %p1349_p3, %p1348_p2 }
  0x2d   :  { %p1351_p5 = pnand %p1350_p4, %p1344_p1 }
  0x2f   :  { %1354 = shalt.err (!%p1351_p5)
}
  0x30   :  { %s1407_s4 = smov 64   ;;  %s1408_s24 = smov 4  }
  0x31   :  { %61 = dma.hbm_to_vmem [thread:$0]  %s1711_s6, 2048, %s56_s22, [#allocation10], %s1407_s4, %s1407_s4, %s1408_s24  }
  0x32   :  { %1385 = dma.done.wait [#allocation7], 256  }
  0x33   :  { %1386 = vsyncadd [#allocation7], 4294967040 }
  0x34   :  { %1387 = dma.done.wait [#allocation10], 4096  }
  0x35   :  { %1388 = vsyncadd [#allocation10], 4294963200  ;;  %s1393_s3 = smov 0  }
  0x36 LB: > { %s82_s27 = sld [smem:[#allocation5 + %s1395_s3]]  ;;  %s84_s9 = scalar_lea.vmem [#allocation2], %s1395_s3  ;;  %s1395_s3 = sphi %s1393_s3, %s80_s3  }
  0x3c   : > { %s83_s30 = scalar_lea.vmem %s1706_s1, %s82_s27 }
  0x3d   : > { %v103_v0 = vld [vmem:[%s83_s30] sm:$0x1] }
  0x3e   : > { %104 = vst [vmem:[%s84_s9] sm:$0x1] %v103_v0 }
  0x3f   : > { %130 = vsyncadd [#allocation3], 16  ;;  %s80_s3 = sadd.s32 1, %s1395_s3  }
  0x40   : > { %p77_p6 = scmp.ge.s32.totalorder %s80_s3, 128  }
  0x41   :  { %vm131_vm0 = vcmask (%p77_p6), 261120   ;;  %v1409_v1 = vmov (%p77_p6), 0.0   ;;  %s1397_s6 = smov (%p77_p6), 0  }
  0x42   :  { %79 = sbr.rel (!%p77_p6) target bundleno = 54 (0x36), region = 112  ;;  %132 = vst.msk [vmem:[#allocation2 + $0x80] sm:$0xff] (%p77_p6), %vm131_vm0, %v1409_v1 }
  0x47 LB: > { %1389 = dma.done.wait [#allocation3], 16  ;;  %s1399_s6 = sphi %s1397_s6, %s138_s6  }
  0x48   : > { %1390 = vsyncadd [#allocation3], 4294967280  ;;  %s138_s6 = sadd.s32 1, %s1399_s6  }
  0x49   : > { %p135_p7 = scmp.ge.s32.totalorder %s138_s6, 128  }
  0x4a   :  { %v142_v2 = vld [vmem:[#allocation2] sm:$0xff] (%p135_p7)  ;;  %v143_v3 = vld [vmem:[#allocation2 + $0x8] sm:$0xff] (%p135_p7)  ;;  %v144_v4 = vld [vmem:[#allocation2 + $0x10] sm:$0xff] (%p135_p7)  ;;  %vm168_vm1 = vsmask.f32 (%p135_p7), 7424  ;;  %v1410_v13 = vmov (%p135_p7), 0  }
  0x4b   :  { %137 = sbr.rel (!%p135_p7) target bundleno = 71 (0x47), region = 123  ;;  %v145_v5 = vld [vmem:[#allocation2 + $0x18] sm:$0xff] (%p135_p7)  ;;  %v1477_v6 = vpack.c.bf16 (%p135_p7), %v143_v3, %v142_v2  ;;  %v146_v7 = vld [vmem:[#allocation2 + $0x20] sm:$0xff] (%p135_p7)  ;;  %v147_v9 = vld [vmem:[#allocation2 + $0x28] sm:$0xff] (%p135_p7)  ;;  %vm296_vm2 = vsmask.f32 (%p135_p7), 6400  ;;  %530 = vmatprep.subr.bf16.mxu0 (%p135_p7), %v1410_v13  ;;  %897 = vmatprep.mubr.bf16.mxu1 (%p135_p7), %v1410_v13 }
  0x4c   :  { %v1479_v8 = vpack.c.bf16 (%p135_p7), %v145_v5, %v144_v4  ;;  %v1483_v12 = vpack.c.bf16 (%p135_p7), %v147_v9, %v146_v7  ;;  %vm262_vm3 = vcmask (%p135_p7), 1046528   ;;  %v148_v17 = vld [vmem:[#allocation2 + $0x30] sm:$0xff] (%p135_p7)  ;;  %v149_v18 = vld [vmem:[#allocation2 + $0x38] sm:$0xff] (%p135_p7)  ;;  %v150_v31 = vld [vmem:[#allocation2 + $0x40] sm:$0xff] (%p135_p7)  ;;  %s1411_s0 = smov (%p135_p7), 32   ;;  %s1412_s13 = smov (%p135_p7), 96  }
  0x4d   :  { %v170_v10 = vshrl.u32 (%p135_p7), %v1477_v6, 16  ;;  %v172_v11 = vshll.u32 (%p135_p7), %v1477_v6, 16  ;;  %v263_v16 = vrot.slane (%p135_p7), %v1477_v6, 1  ;;  %v1492_v30 = vpack.c.bf16 (%p135_p7), %v149_v18, %v148_v17  ;;  %v151_v32 = vld [vmem:[#allocation2 + $0x48] sm:$0xff] (%p135_p7)  ;;  %v1233_v33 = vld [vmem:[%s1707_s2 + $0x38] sm:$0xff] (%p135_p7)   ;;  %v1234_v39 = vld [vmem:[%s1707_s2 + $0x30] sm:$0xff] (%p135_p7)  }
  0x4e   :  { %v177_v14 = vshll.u32 (%p135_p7), %v1479_v8, 16  ;;  %v181_v15 = vshrl.u32 (%p135_p7), %v1479_v8, 16  ;;  %v185_v22 = vshll.u32 (%p135_p7), %v1483_v12, 16  ;;  %v264_v26 = vrot.slane (%p135_p7), %v1479_v8, 1  ;;  %531 = vmatpush1.bf16.msra.mxu0 (%p135_p7), %v1233_v33  ;;  %v1235_v49 = vld [vmem:[%s1707_s2 + $0x28] sm:$0xff] (%p135_p7)   ;;  %v152_v52 = vld [vmem:[#allocation2 + $0x50] sm:$0xff] (%p135_p7) }
  0x4f   :  { %v174_v19 = vrot.slane (%p135_p7), %v172_v11, 1  ;;  %v297_v20 = vrot.slane (%p135_p7), %v170_v10, 1  ;;  %v298_v21 = vrot.slane (%p135_p7), %v172_v11, 2  ;;  %v189_v36 = vshrl.u32 (%p135_p7), %v1483_v12, 16  ;;  %532 = vmatprep.subr.bf16.mxu0 (%p135_p7), %v1410_v13  ;;  %v153_v57 = vld [vmem:[#allocation2 + $0x58] sm:$0xff] (%p135_p7)  ;;  %v154_v61 = vld [vmem:[#allocation2 + $0x60] sm:$0xff] (%p135_p7) }
  0x50   :  { %v179_v23 = vrot.slane %v177_v14, 1  ;;  %v300_v24 = vrot.slane %v181_v15, 1  ;;  %v301_v25 = vrot.slane %v177_v14, 2  ;;  %v187_v29 = vrot.slane %v185_v22, 1  ;;  %v155_v62 = vld [vmem:[#allocation2 + $0x68] sm:$0xff]  ;;  %v1236_v63 = vld [vmem:[%s1707_s2 + $0x20] sm:$0xff]  }
  0x51   :  { %v175_v27 = vor.u32 %v174_v19, %v170_v10  ;;  %v299_v28 = vor.u32 %v298_v21, %v297_v20  ;;  %v305_v37 = vrot.slane %v185_v22, 2  ;;  %v266_v41 = vrot.slane %v1483_v12, 1  ;;  %v1237_v5 = vld [vmem:[%s1707_s2 + $0x18] sm:$0xff]   ;;  %v156_v14 = vld [vmem:[#allocation2 + $0x70] sm:$0xff] }
  0x52   :  { %v302_v34 = vor.u32 %v301_v25, %v300_v24  ;;  %v183_v35 = vor.u32 %v181_v15, %v179_v23  ;;  %v304_v42 = vrot.slane %v189_v36, 1  ;;  %v265_v43 = vsel %vm262_vm3, %v263_v16, %v264_v26  ;;  %533 = vmatpush1.bf16.msra.mxu0 %v1234_v39  ;;  %v157_v15 = vld [vmem:[#allocation2 + $0x78] sm:$0xff]  ;;  %v1238_v20 = vld [vmem:[%s1707_s2 + $0x10] sm:$0xff]  }
  0x53   :  { %v180_v38 = vsel %vm168_vm1, %v175_v27, %v179_v23  ;;  %v193_v44 = vshll.u32 %v1492_v30, 16  ;;  %v197_v45 = vshrl.u32 %v1492_v30, 16  ;;  %v1511_v48 = vpack.c.bf16 %v151_v32, %v150_v31  ;;  %534 = vmatprep.subr.bf16.mxu0 %v1410_v13 }
  0x54   :  { %237 = vrot.lane.b32.xlu0 %v180_v38, %s1411_s0  ;;  %v303_v40 = vsel %vm296_vm2, %v299_v28, %v302_v34  ;;  %v188_v46 = vsel %vm168_vm1, %v183_v35, %v187_v29  ;;  %v306_v47 = vor.u32 %v305_v37, %v304_v42  ;;  %v267_v50 = vsel %vm262_vm3, %v264_v26, %v266_v41 }
  0x55   :  { %334 = vrot.lane.b32.xlu1 %v303_v40, %s1412_s13  ;;  %v268_v51 = vrot.slane %v1492_v30, 1  ;;  %v191_v53 = vor.u32 %v189_v36, %v187_v29  ;;  %v195_v54 = vrot.slane %v193_v44, 1  ;;  %v308_v55 = vrot.slane %v197_v45, 1 }
  0x56   :  { %v309_v56 = vrot.slane %v193_v44, 2  ;;  %v307_v58 = vsel %vm296_vm2, %v302_v34, %v306_v47  ;;  %v201_v59 = vshll.u32 %v1511_v48, 16  ;;  %v205_v60 = vshrl.u32 %v1511_v48, 16  ;;  %535 = vmatpush1.bf16.msra.mxu0 %v1235_v49  ;;  %v1239_v34 = vld [vmem:[%s1707_s2 + $0x8] sm:$0xff]   ;;  %v1240_v49 = vld [vmem:[%s1707_s2] sm:$0xff]  }
  0x57   :  { %v1528_v0 = vpack.c.bf16 %v153_v57, %v152_v52  ;;  %536 = vmatprep.subr.bf16.mxu0 %v1410_v13  ;;  %v196_v1 = vsel %vm168_vm1, %v191_v53, %v195_v54  ;;  %v269_v2 = vsel %vm262_vm3, %v266_v41, %v268_v51  ;;  %v1534_v4 = vpack.c.bf16 %v155_v62, %v154_v61 }
  0x58   :  { %280 = vrot.lane.b32.xlu0 %v265_v43, %s1407_s4  ;;  %v310_v3 = vor.u32 %v309_v56, %v308_v55  ;;  %v199_v7 = vor.u32 %v197_v45, %v195_v54  ;;  %v203_v9 = vrot.slane %v201_v59, 1  ;;  %v312_v10 = vrot.slane %v205_v60, 1  ;;  %v1241_v54 = vld [vmem:[%s1707_s2 + $0x48] sm:$0xff]  }
  0x59   :  { %239 = vrot.lane.b32.xlu1 %v188_v46, %s1411_s0  ;;  %v313_v11 = vrot.slane %v201_v59, 2  ;;  %v270_v16 = vrot.slane %v1511_v48, 1  ;;  %v209_v17 = vshll.u32 %v1528_v0, 16  ;;  %v213_v18 = vshrl.u32 %v1528_v0, 16 }
  0x5a   :  { %537 = vmatpush1.bf16.msra.mxu0 %v1236_v63  ;;  %v311_v19 = vsel %vm296_vm2, %v306_v47, %v310_v3  ;;  %vm350_vm4 = vcmask 1045504   ;;  %v204_v21 = vsel %vm168_vm1, %v199_v7, %v203_v9  ;;  %v217_v23 = vshll.u32 %v1534_v4, 16  ;;  %v158_v47 = vld [vmem:[#allocation2 + $0x80] sm:$0xff] }
  0x5b   :  { %538 = vmatprep.subr.bf16.mxu0 %v1410_v13  ;;  %v314_v22 = vor.u32 %v313_v11, %v312_v10  ;;  %v1551_v24 = vpack.c.bf16 %v157_v15, %v156_v14  ;;  %v351_v25 = vrot.slane %v1477_v6, 2  ;;  %v352_v26 = vrot.slane %v1479_v8, 2 }
  0x5c   :  { %282 = vrot.lane.b32.xlu0 %v267_v50, %s1407_s4  ;;  %v271_v27 = vsel %vm262_vm3, %v268_v51, %v270_v16  ;;  %v211_v28 = vrot.slane %v209_v17, 1  ;;  %v316_v29 = vrot.slane %v213_v18, 1  ;;  %v221_v31 = vshrl.u32 %v1534_v4, 16 }
  0x5d   :  { %336 = vrot.lane.b32.xlu1 %v307_v58, %s1412_s13  ;;  %v207_v32 = vor.u32 %v205_v60, %v203_v9  ;;  %v317_v33 = vrot.slane %v209_v17, 2  ;;  %v353_v35 = vsel %vm350_vm4, %v351_v25, %v352_v26  ;;  %v354_v36 = vrot.slane %v1483_v12, 2 }
  0x5e   :  { %539 = vmatpush1.bf16.msra.mxu0 %v1237_v5  ;;  %v315_v37 = vsel %vm296_vm2, %v310_v3, %v314_v22  ;;  %v272_v38 = vrot.slane %v1528_v0, 1  ;;  %v274_v39 = vrot.slane %v1534_v4, 1  ;;  %1140 = vmatprep.mubr.msk.bf16.mxu0 %vm131_vm0, %v353_v35  ;;  %v219_v40 = vrot.slane %v217_v23, 1  ;;  %v1242_v5 = vld [vmem:[%s1707_s2 + $0x40] sm:$0xff]  }
  0x5f   :  { %540 = vmatprep.subr.bf16.mxu0 %v1410_v13  ;;  %v225_v41 = vshll.u32 %v1551_v24, 16  ;;  %v1573_v42 = vsel %vm350_vm4, %v352_v26, %v354_v36  ;;  %v320_v43 = vrot.slane %v221_v31, 1  ;;  %v321_v44 = vrot.slane %v217_v23, 2 }
  0x60   :  { %241 = vrot.lane.b32.xlu0 %v196_v1, %s1411_s0  ;;  %v212_v45 = vsel %vm168_vm1, %v207_v32, %v211_v28  ;;  %v318_v46 = vor.u32 %v317_v33, %v316_v29  ;;  %v273_v50 = vsel %vm262_vm3, %v270_v16, %v272_v38  ;;  %v215_v51 = vor.u32 %v213_v18, %v211_v28 }
  0x61   :  { %284 = vrot.lane.b32.xlu1 %v269_v2, %s1407_s4  ;;  %v229_v53 = vshrl.u32 %v1551_v24, 16  ;;  %v322_v56 = vor.u32 %v321_v44, %v320_v43  ;;  %v167_v57 = vpack.c.bf16 %v158_v47, %v158_v47  ;;  %v275_v58 = vsel %vm262_vm3, %v272_v38, %v274_v39 }
  0x62   :  { %541 = vmatpush1.bf16.msra.mxu0 %v1238_v20  ;;  %v319_v52 = vsel %vm296_vm2, %v314_v22, %v318_v46  ;;  %v220_v55 = vsel %vm168_vm1, %v215_v51, %v219_v40  ;;  %v227_v59 = vrot.slane %v225_v41, 1  ;;  %v223_v60 = vor.u32 %v221_v31, %v219_v40 }
  0x63   :  { %542 = vmatprep.subr.bf16.mxu0 %v1410_v13  ;;  %v276_v61 = vrot.slane %v1551_v24, 1  ;;  %v324_v62 = vrot.slane %v229_v53, 1  ;;  %v325_v63 = vrot.slane %v225_v41, 2  ;;  %v323_v1 = vsel %vm296_vm2, %v318_v46, %v322_v56 }
  0x64   :  { %338 = vrot.lane.b32.xlu0 %v311_v19, %s1412_s13  ;;  %v233_v2 = vshll.u32 %v167_v57, 16  ;;  %v328_v3 = vshrl.u32 %v167_v57, 16  ;;  %v228_v7 = vsel %vm168_vm1, %v223_v60, %v227_v59  ;;  %v231_v11 = vor.u32 %v229_v53, %v227_v59 }
  0x65   :  { %243 = vrot.lane.b32.xlu1 %v204_v21, %s1411_s0  ;;  %v277_v9 = vsel %vm262_vm3, %v274_v39, %v276_v61  ;;  %v326_v10 = vor.u32 %v325_v63, %v324_v62  ;;  %v278_v18 = vrot.slane %v167_v57, 1  ;;  %v364_v21 = vrot.slane %v1551_v24, 2 }
  0x66   :  { %543 = vmatpush1.bf16.msra.mxu0 %v1239_v34  ;;  %v235_v14 = vrot.slane %v233_v2, 1  ;;  %v330_v15 = vrot.slane %v328_v3, 1  ;;  %v331_v16 = vrot.slane %v233_v2, 2  ;;  %v366_v22 = vrot.slane %v167_v57, 2 }
  0x67   :  { %544 = vmatprep.subr.bf16.mxu0 %v1410_v13  ;;  %v327_v17 = vsel %vm296_vm2, %v322_v56, %v326_v10  ;;  %v279_v20 = vsel %vm262_vm3, %v276_v61, %v278_v18  ;;  %vm384_vm5 = vcmask 523264   ;;  %vm401_vm6 = vcmask 785408  }
  0x68   :  { %286 = vrot.lane.b32.xlu0 %v271_v27, %s1407_s4  ;;  %v332_v19 = vor.u32 %v331_v16, %v330_v15  ;;  %v1618_v25 = vsel %vm350_vm4, %v364_v21, %v366_v22  ;;  %v1248_v22 = vld [vmem:[#allocation9 + $0x60] ss:$8 sps:$4 sm:$0xff]   ;;  %vm769_vm7 = vcmask 1041409   ;;  %vm771_vm8 = vcmask 1042434  }
  0x69   :  { %340 = vrot.lane.b32.xlu1 %v315_v37, %s1412_s13  ;;  %v356_v37 = vrot.slane %v1492_v30, 2  ;;  %vm773_vm9 = vcmask 1043459   ;;  %vm775_vm10 = vcmask 1044484   ;;  %vm777_vm11 = vcmask 1045509  }
  0x6a   :  { %545 = vmatpush1.bf16.msra.mxu0 %v1240_v49  ;;  %v333_v23 = vsel %vm296_vm2, %v326_v10, %v332_v19  ;;  %v1243_v19 = vld [vmem:[#allocation9 + $0x74] ss:$8 sps:$4 sm:$0xff]   ;;  %vm779_vm12 = vcmask 1046534   ;;  %vm781_vm13 = vcmask 1047559  }
  0x6b   :  { %558 = vmatprep.subr.bf16.mxu0 %v1410_v13  ;;  %v357_v40 = vsel %vm350_vm4, %v354_v36, %v356_v37  ;;  %865 = vmatprep.subr.bf16.mxu1 %v1243_v19 }
  0x6c   :  { %245 = vrot.lane.b32.xlu0 %v212_v45, %s1411_s0 }
  0x6d   :  { %288 = vrot.lane.b32.xlu1 %v273_v50, %s1407_s4 }
  0x6e   :  { %559 = vmatpush2.bf16.msra.mxu0 %v1241_v54 }
  0x6f   :  { %560 = vmatprep.subr.bf16.mxu0 %v1410_v13  ;;  %v236_v13 = vsel %vm168_vm1, %v231_v11, %v235_v14 }
  0x70   :  { %342 = vrot.lane.b32.xlu0 %v319_v52, %s1412_s13 }
  0x71   :  { %247 = vrot.lane.b32.xlu1 %v220_v55, %s1411_s0 }
  0x72   :  { %561 = vmatpush2.bf16.msra.mxu0 %v1242_v5 }
  0x74   :  { %290 = vrot.lane.b32.xlu0 %v275_v58, %s1407_s4 }
  0x75   :  { %344 = vrot.lane.b32.xlu1 %v323_v1, %s1412_s13 }
  0x78   :  { %249 = vrot.lane.b32.xlu0 %v228_v7, %s1411_s0 }
  0x79   :  { %292 = vrot.lane.b32.xlu1 %v277_v9, %s1407_s4 }
  0x7c   :  { %346 = vrot.lane.b32.xlu0 %v327_v17, %s1412_s13 }
  0x7d   :  { %251 = vrot.lane.b32.xlu1 %v236_v13, %s1411_s0 }
  0x80   :  { %294 = vrot.lane.b32.xlu0 %v279_v20, %s1407_s4  ;;  %v1245_v20 = vld [vmem:[#allocation9 + $0x70] ss:$8 sps:$4 sm:$0xff]  }
  0x81   :  { %348 = vrot.lane.b32.xlu1 %v333_v23, %s1412_s13  ;;  %866 = vmatpush1.bf16.msra.mxu1 %v1245_v20  ;;  %v1249_v23 = vld [vmem:[#allocation9 + $0x54] ss:$8 sps:$4 sm:$0xff]  }
  0xc6   :  { %v238_v26 = vpop.permute.xlu0 %237 }
  0xc7   :  { %v335_v27 = vpop.permute.xlu1 %334  ;;  %v369_v28 = vsel %vm131_vm0, %v1477_v6, %v238_v26  ;;  %v1252_v26 = vld [vmem:[#allocation9 + $0x44] ss:$8 sps:$4 sm:$0xff]  }
  0xca   :  { %v281_v29 = vpop.permute.xlu0 %280 }
  0xcb   :  { %v386_v31 = vsel %vm384_vm5, %v369_v28, %v281_v29  ;;  %v240_v32 = vpop.permute.xlu1 %239  ;;  %v1257_v28 = vld [vmem:[#allocation9 + $0x30] ss:$8 sps:$4 sm:$0xff]   ;;  %v1258_v29 = vld [vmem:[#allocation9 + $0x24] ss:$8 sps:$4 sm:$0xff]  }
  0xcc   :  { %v403_v33 = vsel %vm401_vm6, %v386_v31, %v335_v27  ;;  %v371_v34 = vsel %vm131_vm0, %v1479_v8, %v240_v32  ;;  %v1255_v27 = vld [vmem:[#allocation9 + $0x34] ss:$8 sps:$4 sm:$0xff]   ;;  %v1260_v31 = vld [vmem:[#allocation9 + $0x20] ss:$8 sps:$4 sm:$0xff]  }
  0xcd   :  { %563 = vmatmul.mubr.bf16.vlgmr.msra.gmra.mxu0 %v403_v33  ;;  %v1261_v32 = vld [vmem:[#allocation9 + $0x14] ss:$8 sps:$4 sm:$0xff]   ;;  %v1263_v33 = vld [vmem:[#allocation9 + $0x10] ss:$8 sps:$4 sm:$0xff]  }
  0xce   :  { %v283_v35 = vpop.permute.xlu0 %282  ;;  %1141 = vmatprep.mubr.msk.bf16.mxu0 %vm131_vm0, %v1573_v42  ;;  %v358_v42 = vrot.slane %v1511_v48, 2 }
  0xcf   :  { %v388_v38 = vsel %vm384_vm5, %v371_v34, %v283_v35  ;;  %v337_v39 = vpop.permute.xlu1 %336  ;;  %v1264_v34 = vld [vmem:[#allocation9 + $0x4] ss:$8 sps:$4 sm:$0xff]   ;;  %v1266_v35 = vld [vmem:[#allocation9] ss:$8 sps:$4 sm:$0xff]  }
  0xd0   :  { %v406_v41 = vsel %vm401_vm6, %v388_v38, %v337_v39  ;;  %v359_v47 = vsel %vm350_vm4, %v356_v37, %v358_v42  ;;  %v1267_v37 = vld [vmem:[#allocation11 + $0x78] sm:$0xff]  }
  0xd2   :  { %v242_v6 = vpop.permute.xlu0 %241 }
  0xd3   :  { %v285_v43 = vpop.permute.xlu1 %284  ;;  %v373_v8 = vsel %vm131_vm0, %v1483_v12, %v242_v6  ;;  %v360_v12 = vrot.slane %v1528_v0, 2 }
  0xd4   :  { %v390_v44 = vsel %vm384_vm5, %v373_v8, %v285_v43 }
  0xd5   :  { %571 = vmatmul.mubr.bf16.gmra.mxu0 %v406_v41  ;;  %v361_v54 = vsel %vm350_vm4, %v358_v42, %v360_v12 }
  0xd6   :  { %1142 = vmatprep.mubr.msk.bf16.mxu0 %vm131_vm0, %v357_v40  ;;  %v339_v45 = vpop.permute.xlu0 %338 }
  0xd7   :  { %v244_v46 = vpop.permute.xlu1 %243  ;;  %v409_v49 = vsel %vm401_vm6, %v390_v44, %v339_v45 }
  0xd8   :  { %v375_v50 = vsel %vm131_vm0, %v1492_v30, %v244_v46  ;;  %v362_v30 = vrot.slane %v1534_v4, 2 }
  0xda   :  { %v287_v36 = vpop.permute.xlu0 %286  ;;  %v363_v61 = vsel %vm350_vm4, %v360_v12, %v362_v30  ;;  %v365_v5 = vsel %vm350_vm4, %v362_v30, %v364_v21  ;;  %v1246_v21 = vld [vmem:[#allocation9 + $0x64] ss:$8 sps:$4 sm:$0xff]  }
  0xdb   :  { %v392_v51 = vsel %vm384_vm5, %v375_v50, %v287_v36  ;;  %v341_v52 = vpop.permute.xlu1 %340  ;;  %867 = vmatprep.subr.bf16.mxu1 %v1246_v21 }
  0xdc   :  { %v412_v55 = vsel %vm401_vm6, %v392_v51, %v341_v52  ;;  %868 = vmatpush1.bf16.msra.mxu1 %v1248_v22  ;;  %v1676_v51 = vld [vmem:[#allocation6 + $0x8] sm:$0xff] }
  0xdd   :  { %579 = vmatmul.mubr.bf16.gmra.mxu0 %v409_v49  ;;  %869 = vmatprep.subr.bf16.mxu1 %v1249_v23 }
  0xde   :  { %1143 = vmatprep.mubr.msk.bf16.mxu0 %vm131_vm0, %v359_v47  ;;  %v246_v53 = vpop.permute.xlu0 %245 }
  0xdf   :  { %v289_v56 = vpop.permute.xlu1 %288  ;;  %v377_v57 = vsel %vm131_vm0, %v1511_v48, %v246_v53  ;;  %v1678_v53 = vld [vmem:[#allocation6] sm:$0xff] }
  0xe0   :  { %v394_v58 = vsel %vm384_vm5, %v377_v57, %v289_v56 }
  0xe2   :  { %v343_v59 = vpop.permute.xlu0 %342 }
  0xe3   :  { %v248_v60 = vpop.permute.xlu1 %247  ;;  %v415_v62 = vsel %vm401_vm6, %v394_v58, %v343_v59 }
  0xe4   :  { %v379_v1 = vsel %vm131_vm0, %v1528_v0, %v248_v60 }
  0xe5   :  { %587 = vmatmul.mubr.bf16.gmra.mxu0 %v412_v55 }
  0xe6   :  { %1144 = vmatprep.mubr.msk.bf16.mxu0 %vm131_vm0, %v361_v54  ;;  %v291_v63 = vpop.permute.xlu0 %290 }
  0xe7   :  { %v396_v48 = vsel %vm384_vm5, %v379_v1, %v291_v63  ;;  %v345_v2 = vpop.permute.xlu1 %344 }
  0xe8   :  { %v418_v7 = vsel %vm401_vm6, %v396_v48, %v345_v2 }
  0xea   :  { %v250_v3 = vpop.permute.xlu0 %249 }
  0xeb   :  { %v293_v9 = vpop.permute.xlu1 %292  ;;  %v381_v10 = vsel %vm131_vm0, %v1534_v4, %v250_v3 }
  0xec   :  { %v398_v0 = vsel %vm384_vm5, %v381_v10, %v293_v9 }
  0xed   :  { %595 = vmatmul.mubr.bf16.gmra.mxu0 %v415_v62 }
  0xee   :  { %1145 = vmatprep.mubr.msk.bf16.mxu0 %vm131_vm0, %v363_v61  ;;  %v347_v11 = vpop.permute.xlu0 %346 }
  0xef   :  { %v252_v14 = vpop.permute.xlu1 %251  ;;  %v421_v15 = vsel %vm401_vm6, %v398_v0, %v347_v11 }
  0xf0   :  { %v383_v16 = vsel %vm131_vm0, %v1551_v24, %v252_v14  ;;  %v1251_v24 = vld [vmem:[#allocation9 + $0x50] ss:$8 sps:$4 sm:$0xff]  }
  0xf1   :  { %870 = vmatpush1.bf16.msra.mxu1 %v1251_v24 }
  0xf2   :  { %v295_v17 = vpop.permute.xlu0 %294  ;;  %871 = vmatprep.subr.bf16.mxu1 %v1252_v26 }
  0xf3   :  { %v400_v18 = vsel %vm384_vm5, %v383_v16, %v295_v17  ;;  %v349_v13 = vpop.permute.xlu1 %348 }
  0xf4   :  { %v424_v4 = vsel %vm401_vm6, %v400_v18, %v349_v13 }
  0xf5   :  { %603 = vmatmul.mubr.bf16.gmra.mxu0 %v418_v7 }
  0xf6   :  { %1146 = vmatprep.mubr.msk.bf16.mxu0 %vm131_vm0, %v365_v5 }
  0xfd   :  { %611 = vmatmul.mubr.bf16.gmra.mxu0 %v421_v15 }
  0xfe   :  { %1147 = vmatprep.mubr.msk.bf16.mxu0 %vm131_vm0, %v1618_v25  ;;  %v1254_v25 = vld [vmem:[#allocation9 + $0x40] ss:$8 sps:$4 sm:$0xff]  }
  0xff   :  { %872 = vmatpush1.bf16.msra.mxu1 %v1254_v25 }
 0x100   :  { %873 = vmatprep.subr.bf16.mxu1 %v1255_v27 }
 0x103   :  { %874 = vmatpush1.bf16.msra.mxu1 %v1257_v28 }
 0x104   :  { %875 = vmatprep.subr.bf16.mxu1 %v1258_v29 }
 0x105   :  { %619 = vmatmul.mubr.bf16.gmra.mxu0 %v424_v4 }
 0x107   :  { %876 = vmatpush1.bf16.msra.mxu1 %v1260_v31 }
 0x108   :  { %877 = vmatprep.subr.bf16.mxu1 %v1261_v32 }
 0x10b   :  { %878 = vmatpush1.bf16.msra.mxu1 %v1263_v33 }
 0x10c   :  { %879 = vmatprep.subr.bf16.mxu1 %v1264_v34 }
 0x10f   :  { %880 = vmatpush1.bf16.msra.mxu1 %v1266_v35 }
 0x110   :  { %1182 = vmatprep.subr.bf16.mxu1 %v1267_v37 }
 0x18d   :  { %v564_v38 = vpop.f32.mrf.mxu0 }
 0x18e   :  { %v629_v59 = vadd.f32 %v1678_v53, %v564_v38 }
 0x18f   :  { %v566_v39 = vpop.f32.mrf.mxu0 }
 0x190   :  { %v645_v10 = vmax.f32 %v629_v59, 0.0 }
 0x191   :  { %v567_v6 = vpop.f32.mrf.mxu0 }
 0x192   :  { %v630_v55 = vadd.f32 %v1676_v51, %v567_v6 }
 0x193   :  { %v569_v40 = vpop.f32.mrf.mxu0 }
 0x194   :  { %v646_v48 = vmax.f32 %v630_v55, 0.0 }
 0x195   :  { %v572_v41 = vpop.f32.mrf.mxu0 }
 0x196   :  { %v631_v30 = vadd.f32 %v1678_v53, %v572_v41  ;;  %v661_v17 = vmax.f32 %v645_v10, %v646_v48 }
 0x197   :  { %v574_v43 = vpop.f32.mrf.mxu0 }
 0x198   :  { %v647_v7 = vmax.f32 %v631_v30, 0.0  ;;  %v662_v26 = vrot.slane %v661_v17, 4 }
 0x199   :  { %v575_v8 = vpop.f32.mrf.mxu0 }
 0x19a   :  { %v632_v54 = vadd.f32 %v1676_v51, %v575_v8  ;;  %v663_v37 = vmax.f32 %v661_v17, %v662_v26 }
 0x19b   :  { %v577_v42 = vpop.f32.mrf.mxu0 }
 0x19c   :  { %v648_v62 = vmax.f32 %v632_v54, 0.0 }
 0x19d   :  { %v580_v44 = vpop.f32.mrf.mxu0 }
 0x19e   :  { %v633_v60 = vadd.f32 %v1678_v53, %v580_v44  ;;  %v668_v15 = vmax.f32 %v647_v7, %v648_v62 }
 0x19f   :  { %v582_v45 = vpop.f32.mrf.mxu0 }
 0x1a0   :  { %v649_v0 = vmax.f32 %v633_v60, 0.0  ;;  %v669_v23 = vrot.slane %v668_v15, 4 }
 0x1a1   :  { %v583_v46 = vpop.f32.mrf.mxu0 }
 0x1a2   :  { %v634_v56 = vadd.f32 %v1676_v51, %v583_v46  ;;  %v670_v34 = vmax.f32 %v668_v15, %v669_v23  ;;  %v664_v46 = vrot.slane %v663_v37, 2 }
 0x1a3   :  { %v585_v47 = vpop.f32.mrf.mxu0 }
 0x1a4   :  { %v650_v2 = vmax.f32 %v634_v56, 0.0  ;;  %v671_v42 = vrot.slane %v670_v34, 2  ;;  %v665_v30 = vmax.f32 %v663_v37, %v664_v46 }
 0x1a5   :  { %v588_v49 = vpop.f32.mrf.mxu0 }
 0x1a6   :  { %v635_v63 = vadd.f32 %v1678_v53, %v588_v49  ;;  %v675_v18 = vmax.f32 %v649_v0, %v650_v2  ;;  %v672_v55 = vmax.f32 %v670_v34, %v671_v42  ;;  %v666_v7 = vrot.slane %v665_v30, 1 }
 0x1a7   :  { %v590_v36 = vpop.f32.mrf.mxu0 }
 0x1a8   :  { %v651_v16 = vmax.f32 %v635_v63, 0.0  ;;  %v676_v25 = vrot.slane %v675_v18, 4  ;;  %v673_v48 = vrot.slane %v672_v55, 1 }
 0x1a9   :  { %v591_v50 = vpop.f32.mrf.mxu0 }
 0x1aa   :  { %v636_v58 = vadd.f32 %v1676_v51, %v591_v50  ;;  %v677_v38 = vmax.f32 %v675_v18, %v676_v25  ;;  %v674_v17 = vmax.f32 %v672_v55, %v673_v48  ;;  %v1279_v48 = vld [vmem:[#allocation11 + $0x48] sm:$0xff]  }
 0x1ab   :  { %v593_v12 = vpop.f32.mrf.mxu0 }
 0x1ac   :  { %v652_v9 = vmax.f32 %v636_v58, 0.0  ;;  %v678_v47 = vrot.slane %v677_v38, 2 }
 0x1ad   :  { %v596_v52 = vpop.f32.mrf.mxu0 }
 0x1ae   :  { %v637_v3 = vadd.f32 %v1678_v53, %v596_v52  ;;  %v682_v19 = vmax.f32 %v651_v16, %v652_v9  ;;  %v679_v58 = vmax.f32 %v677_v38, %v678_v47 }
 0x1af   :  { %v598_v57 = vpop.f32.mrf.mxu0 }
 0x1b0   :  { %v653_v13 = vmax.f32 %v637_v3, 0.0  ;;  %v683_v28 = vrot.slane %v682_v19, 4  ;;  %v680_v9 = vrot.slane %v679_v58, 1 }
 0x1b1   :  { %v599_v61 = vpop.f32.mrf.mxu0 }
 0x1b2   :  { %v638_v1 = vadd.f32 %v1676_v51, %v599_v61  ;;  %v684_v6 = vmax.f32 %v682_v19, %v683_v28  ;;  %v667_v19 = vmax.f32 %v665_v30, %v666_v7  ;;  %v1271_v30 = vld [vmem:[#allocation11 + $0x68] sm:$0xff]   ;;  %v743_v7 = vlaneseq }
 0x1b3   :  { %v601_v5 = vpop.f32.mrf.mxu0 }
 0x1b4   :  { %v654_v11 = vmax.f32 %v638_v1, 0.0  ;;  %v685_v36 = vrot.slane %v684_v6, 2  ;;  %v717_v28 = vpack.c.bf16 %v667_v19, %v667_v19 }
 0x1b5   :  { %v604_v14 = vpop.f32.mrf.mxu0 }
 0x1b6   :  { %v639_v20 = vadd.f32 %v1678_v53, %v604_v14  ;;  %v689_v21 = vmax.f32 %v653_v13, %v654_v11  ;;  %v686_v60 = vmax.f32 %v684_v6, %v685_v36 }
 0x1b7   :  { %v606_v4 = vpop.f32.mrf.mxu0 }
 0x1b8   :  { %v655_v29 = vmax.f32 %v639_v20, 0.0  ;;  %v690_v32 = vrot.slane %v689_v21, 4  ;;  %v687_v0 = vrot.slane %v686_v60, 1 }
 0x1b9   :  { %v607_v22 = vpop.f32.mrf.mxu0 }
 0x1ba   :  { %v640_v24 = vadd.f32 %v1676_v51, %v607_v22  ;;  %v691_v43 = vmax.f32 %v689_v21, %v690_v32  ;;  %v688_v20 = vmax.f32 %v686_v60, %v687_v0  ;;  %v1274_v60 = vld [vmem:[#allocation11 + $0x20] sm:$0xff]   ;;  %v741_v0 = vld [vmem:[%s1710_s5] sm:$0x3]  ;;  %s1413_s5 = smov [#allocation12]  }
 0x1bb   :  { %v609_v27 = vpop.f32.mrf.mxu0  ;;  %s1092_s9 = sshll.u32 %s1413_s5, 4  ;;  %s1093_s9 = int_to_ptr.vmem [resolvable:$true] %s1092_s9 }
 0x1bc   :  { %v656_v31 = vmax.f32 %v640_v24, 0.0  ;;  %v692_v52 = vrot.slane %v691_v43, 2  ;;  %v718_v24 = vpack.c.bf16 %v674_v17, %v674_v17  ;;  %s1355_s6 = scalar_lea.vmem %s1093_s9, 128  ;;  %p1360_p9 = scmp.lt.s32.totalorder %s1093_s9, %s1093_s9 }
 0x1bd   :  { %v612_v33 = vpop.f32.mrf.mxu0  ;;  %p1356_p8 = scmp.ne.s32.totalorder %s1093_s9, %s1355_s6  ;;  %p1361_p10 = scmp.lt.s32.totalorder %s1355_s6, %s1355_s6 }
 0x1be   :  { %v696_v35 = vmax.f32 %v655_v29, %v656_v31  ;;  %v641_v41 = vadd.f32 %v1678_v53, %v612_v33  ;;  %v693_v63 = vmax.f32 %v691_v43, %v692_v52  ;;  %v720_v29 = vpack.c.bf16 %v688_v20, %v688_v20 }
 0x1bf   :  { %v614_v39 = vpop.f32.mrf.mxu0  ;;  %v762_v33 = vunpack.c.l.b16 %v718_v24  ;;  %p1362_p11 = por %p1361_p10, %p1360_p9 }
 0x1c0   :  { %v697_v40 = vrot.slane %v696_v35, 4  ;;  %v657_v50 = vmax.f32 %v641_v41, 0.0  ;;  %v694_v16 = vrot.slane %v693_v63, 1  ;;  %v761_v39 = vunpack.c.l.b16 %v717_v28 }
 0x1c1   :  { %v615_v8 = vpop.f32.mrf.mxu0  ;;  %v764_v6 = vunpack.c.l.b16 %v720_v29  ;;  %p1363_p12 = pnand %p1362_p11, %p1356_p8 }
 0x1c2   :  { %v698_v44 = vmax.f32 %v696_v35, %v697_v40  ;;  %v642_v45 = vadd.f32 %v1676_v51, %v615_v8  ;;  %v695_v23 = vmax.f32 %v693_v63, %v694_v16  ;;  %v770_v43 = vsel %vm769_vm7, %v762_v33, %v761_v39  ;;  %v1277_v63 = vld [vmem:[#allocation11 + $0x50] sm:$0xff]  }
 0x1c3   :  { %v617_v49 = vpop.f32.mrf.mxu0 }
 0x1c4   :  { %v658_v12 = vmax.f32 %v642_v45, 0.0  ;;  %v699_v56 = vrot.slane %v698_v44, 2  ;;  %v721_v32 = vpack.c.bf16 %v695_v23, %v695_v23 }
 0x1c5   :  { %v620_v54 = vpop.f32.mrf.mxu0 }
 0x1c6   :  { %v703_v57 = vmax.f32 %v657_v50, %v658_v12  ;;  %v643_v62 = vadd.f32 %v1678_v53, %v620_v54  ;;  %v700_v2 = vmax.f32 %v698_v44, %v699_v56  ;;  %v681_v53 = vmax.f32 %v679_v58, %v680_v9  ;;  %v1268_v54 = vld [vmem:[#allocation11 + $0x38] sm:$0xff]   ;;  %v1269_v56 = vld [vmem:[#allocation11 + $0x70] sm:$0xff]   ;;  %v1272_v58 = vld [vmem:[#allocation11 + $0x28] sm:$0xff]  }
 0x1c7   :  { %v622_v59 = vpop.f32.mrf.mxu0  ;;  %v765_v41 = vunpack.c.l.b16 %v721_v32  ;;  %v744_v9 = vshrl.u32 %v743_v7, 7 }
 0x1c8   :  { %v704_v61 = vrot.slane %v703_v57, 4  ;;  %v659_v14 = vmax.f32 %v643_v62, 0.0  ;;  %v701_v18 = vrot.slane %v700_v2, 1  ;;  %v719_v25 = vpack.c.bf16 %v681_v53, %v681_v53  ;;  %v1273_v59 = vld [vmem:[#allocation11 + $0x60] sm:$0xff]   ;;  %v1276_v62 = vld [vmem:[#allocation11 + $0x18] sm:$0xff]  }
 0x1c9   :  { %v623_v1 = vpop.f32.mrf.mxu0 }
 0x1ca   :  { %v705_v3 = vmax.f32 %v703_v57, %v704_v61  ;;  %v644_v5 = vadd.f32 %v1676_v51, %v623_v1  ;;  %v702_v51 = vmax.f32 %v700_v2, %v701_v18  ;;  %v763_v37 = vunpack.c.l.b16 %v719_v25  ;;  %v1270_v57 = vld [vmem:[#allocation11 + $0x30] sm:$0xff]   ;;  %v1275_v61 = vld [vmem:[#allocation11 + $0x58] sm:$0xff]   ;;  %v1280_v2 = vld [vmem:[#allocation11 + $0x8] sm:$0xff]  }
 0x1cb   :  { %v625_v10 = vpop.f32.mrf.mxu0  ;;  %v1278_v1 = vld [vmem:[#allocation11 + $0x10] sm:$0xff]  }
 0x1cc   :  { %v706_v11 = vrot.slane %v705_v3, 2  ;;  %v660_v15 = vmax.f32 %v644_v5, 0.0  ;;  %v722_v34 = vpack.c.bf16 %v702_v51, %v702_v51  ;;  %v772_v44 = vsel %vm771_vm8, %v763_v37, %v770_v43  ;;  %v1282_v5 = vld [vmem:[#allocation11] sm:$0xff]   ;;  %v1164_v51 = vld [vmem:[%s1712_s7] ss:$0 sm:$0xff] }
 0x1cd   :  { %v774_v47 = vsel %vm773_vm9, %v764_v6, %v772_v44  ;;  %v745_v10 = vsub.s32 0, %v744_v9 }
 0x1ce   :  { %v707_v13 = vmax.f32 %v705_v3, %v706_v11  ;;  %v710_v4 = vmax.f32 %v659_v14, %v660_v15  ;;  %v766_v8 = vunpack.c.l.b16 %v722_v34  ;;  %v776_v49 = vsel %vm775_vm10, %v765_v41, %v774_v47  ;;  %v1281_v3 = vld [vmem:[#allocation11 + $0x40] sm:$0xff]  }
 0x1cf   :  { %v749_v11 = vsub.s32 1, %v744_v9  ;;  %v746_v14 = vrot.slane %v741_v0, %v745_v10 }
 0x1d0   :  { %v708_v21 = vrot.slane %v707_v13, 1  ;;  %v711_v22 = vrot.slane %v710_v4, 4  ;;  %v778_v50 = vsel %vm777_vm11, %v766_v8, %v776_v49 }
 0x1d1   :  { %v750_v15 = vrot.slane %v741_v0, %v749_v11 }
 0x1d2   :  { %v712_v26 = vmax.f32 %v710_v4, %v711_v22  ;;  %v709_v27 = vmax.f32 %v707_v13, %v708_v21 }
 0x1d4   :  { %v713_v31 = vrot.slane %v712_v26, 2  ;;  %v723_v38 = vpack.c.bf16 %v709_v27, %v709_v27 }
 0x1d6   :  { %v714_v35 = vmax.f32 %v712_v26, %v713_v31  ;;  %v767_v45 = vunpack.c.l.b16 %v723_v38 }
 0x1d8   :  { %v715_v40 = vrot.slane %v714_v35, 1  ;;  %v780_v12 = vsel %vm779_vm12, %v767_v45, %v778_v50 }
 0x1da   :  { %v716_v42 = vmax.f32 %v714_v35, %v715_v40 }
 0x1dc   :  { %v724_v46 = vpack.c.bf16 %v716_v42, %v716_v42 }
 0x1de   :  { %v768_v36 = vunpack.c.l.b16 %v724_v46 }
 0x1e0   :  { %v782_v52 = vsel %vm781_vm13, %v768_v36, %v780_v12 }
 0x1e1   :  { %v783_v55 = vpack.c.b16 %v782_v52, %v782_v52 }
 0x1e3   :  { %898 = vmatmul.mubr.bf16.vlgmr.msra.gmra.mxu1 %v783_v55 }
 0x1e4   :  { %1183 = vmatpush3.bf16.msra.mxu1 %v1268_v54 }
 0x1e5   :  { %1184 = vmatprep.subr.bf16.mxu1 %v1269_v56 }
 0x1e8   :  { %1185 = vmatpush3.bf16.msra.mxu1 %v1270_v57 }
 0x1e9   :  { %1186 = vmatprep.subr.bf16.mxu1 %v1271_v30 }
 0x1ec   :  { %1187 = vmatpush3.bf16.msra.mxu1 %v1272_v58 }
 0x1ed   :  { %1188 = vmatprep.subr.bf16.mxu1 %v1273_v59 }
 0x1f0   :  { %1189 = vmatpush3.bf16.msra.mxu1 %v1274_v60 }
 0x1f1   :  { %1190 = vmatprep.subr.bf16.mxu1 %v1275_v61 }
 0x1f4   :  { %1191 = vmatpush3.bf16.msra.mxu1 %v1276_v62 }
 0x1f5   :  { %1192 = vmatprep.subr.bf16.mxu1 %v1277_v63 }
 0x1f8   :  { %1193 = vmatpush3.bf16.msra.mxu1 %v1278_v1 }
 0x1f9   :  { %1194 = vmatprep.subr.bf16.mxu1 %v1279_v48 }
 0x1fc   :  { %1195 = vmatpush3.bf16.msra.mxu1 %v1280_v2 }
 0x1fd   :  { %1196 = vmatprep.subr.bf16.mxu1 %v1281_v3 }
 0x200   :  { %1197 = vmatpush3.bf16.msra.mxu1 %v1282_v5 }
 0x2a3   :  { %v899_v16 = vpop.f32.mrf.mxu1 }
 0x2a4   :  { %v900_v17 = vadd.f32 %v899_v16, %v746_v14 }
 0x2a5   :  { %v901_v18 = vpop.f32.mrf.mxu1 }
 0x2a6   :  { %v902_v13 = vadd.f32 %v901_v18, %v750_v15  ;;  %v906_v4 = vmax.f32 %v900_v17, 0.0 }
 0x2a7   :  { %v903_v53 = vpop.f32.mrf.mxu1 }
 0x2a8   :  { %v907_v19 = vmax.f32 %v902_v13, 0.0  ;;  %v908_v22 = vpack.c.bf16 %v906_v4, %v906_v4 }
 0x2a9   :  { %v904_v20 = vpop.f32.mrf.mxu1 }
 0x2aa   :  { %v909_v21 = vpack.c.bf16 %v907_v19, %v907_v19 }
 0x2ac   :  { %1077 = vmatprep.mubr.bf16.mxu1 %v909_v21 }
 0x2ad   :  { %1078 = vmatmul.mubr.bf16.vlgmr.msra.gmra.mxu1 %v908_v22 }
 0x36d   :  { %v1198_v23 = vpop.f32.mrf.mxu1 }
 0x36f   :  { %v1199_v24 = vpop.f32.mrf.mxu1 }
 0x370   :  { %v1200_v26 = vadd.f32 %v1199_v24, %v1198_v23 }
 0x371   :  { %v1201_v25 = vpop.f32.mrf.mxu1 }
 0x372   :  { %v1080_v27 = vadd.f32 %v1200_v26, %v1164_v51 }
 0x373   :  { %v1202_v28 = vpop.f32.mrf.mxu1 }
 0x374   :  { %1085 = vst [vmem:[#allocation12] sm:$0xff] %v1080_v27 }
 0x375   :  { %1366 = shalt.err (!%p1363_p12)
}
 0x376   :  { %1095 = dma.vmem_to_hbm [thread:$0]  %s1093_s9, 128, %s1713_s8, [#allocation8]  }
 0x377   :  { %1391 = dma.done.wait [#allocation8], 128  }
 0x378   :  { %1392 = vsyncadd [#allocation8], 4294967168 }
 0x379   :  { %1099 = vsyncpa [#allocation7], 1 }
 0x37a   :  { %1100 = vsyncpa [#allocation10], 1 }
 0x37b   :  { %1101 = vsyncpa [#allocation8], 1 }
 0x37c   :  { %1102 = vsyncmov [#allocation3] }
 0x37f   :  { %s1103_s7 = vpop.sfrf %1102 }
 0x380   :  { %p1181_p13 = scmp.ne.s32.totalorder %s1103_s7, 0 }
 0x382   :  { %1107 = shalt.err (%p1181_p13)  }

</bundles_post_ra>
